<compile_context>
chip_gen: v6e
topology: v6e:2x2x1
jax: 0.10.0
libtpu: 0.0.40
codegen_flags: <defaults>
</compile_context>

<pallas_src>
import functools

import jax
import jax.numpy as jnp
from jax.experimental import pallas as pl
from jax.experimental.pallas import tpu as pltpu

# ----------------------------- model config -----------------------------
N_WORDS = 8         # number of word positions (rows of word_embeddings)
KV_HIDDEN = 128     # kv_hidden_size  (input of v_proj)
HIDDEN = 128        # hidden_size     (v_proj out / o_proj in)
Q_HIDDEN = 128      # q_hidden_size   (o_proj out)  -> lane-dense output
TOTAL_BYTES = 32    # static sum(word_lens_bytes); JAX needs static shapes


# ----------------------------- weight fusion -----------------------------
def fuse_guide_weights(w_v, w_o):
    """Pre-fuse v_proj and o_proj at weight-load time (NOT per call).

    Re-associates (x @ W_v) @ W_o into x @ (W_v @ W_o); fused weight is stored
    in bf16 for single-pass MXU + halved DMA bytes.
    """
    return (w_v.astype(jnp.float32) @ w_o.astype(jnp.float32)).astype(jnp.bfloat16)


# ----------------------------- Pallas kernel -----------------------------
def _guide_kernel(lens_ref, x_ref, wf_ref, o_ref, *, n_words):
    """lens_ref: SMEM [n_words] int32; x_ref: VMEM [n_words, kv] bf16;
    wf_ref: VMEM [kv, q] bf16; o_ref: VMEM [total_bytes, q] f32."""
    # Single fused projection; f32 accumulation on the MXU.
    out_w = jnp.dot(x_ref[...], wf_ref[...],
                    preferred_element_type=jnp.float32)          # [N, Q] f32

    # repeat_interleave(out_w, word_lens_bytes, dim=0) as an unrolled VPU
    # select: byte-row i copies word-row j iff start_j <= i < start_j + len_j.
    # int32 compare + f32 select -> full VALU rate on v5e/v6e/v7x, and the
    # copied rows stay bit-exact w.r.t. the f32 accumulator.
    t, q = o_ref.shape
    rows = jax.lax.broadcasted_iota(jnp.int32, (t, 1), 0)        # [T, 1]
    acc = jnp.zeros((t, q), jnp.float32)
    start = jnp.int32(0)
    for j in range(n_words):                                     # static unroll (N=8)
        end = start + lens_ref[j]
        mask = (rows >= start) & (rows < end)                    # [T, 1] bool
        acc = jnp.where(mask, out_w[j, :][None, :], acc)         # zero-length words never hit
        start = end
    o_ref[...] = acc.astype(o_ref.dtype)


def hat_guide_vector_add(word_embeddings, w_fused, word_lens_bytes, total_bytes):
    """word_embeddings: [N, kv_hidden]; w_fused: [kv_hidden, q_hidden] (bf16,
    from fuse_guide_weights); word_lens_bytes: [N] int32 with
    sum == total_bytes (static)."""
    n_words = word_embeddings.shape[0]
    q_hidden = w_fused.shape[1]
    out_dtype = word_embeddings.dtype

    if word_lens_bytes is None:
        # torch path skips the repeat entirely == repeat with all-ones lengths.
        word_lens_bytes = jnp.ones((n_words,), jnp.int32)
        total_bytes = n_words

    # TODO(synk): torch's output length is data-dependent (sum of lengths);
    # JAX requires the static total_bytes to be supplied and to match the sum.
    x_bf16 = word_embeddings.astype(jnp.bfloat16)
    lens_i32 = word_lens_bytes.astype(jnp.int32)

    flops = 2 * n_words * x_bf16.shape[1] * q_hidden
    bytes_accessed = (x_bf16.size * 2 + w_fused.size * 2 + lens_i32.size * 4
                      + total_bytes * q_hidden * 4)

    return pl.pallas_call(
        functools.partial(_guide_kernel, n_words=n_words),
        out_shape=jax.ShapeDtypeStruct((total_bytes, q_hidden), out_dtype),
        in_specs=[
            pl.BlockSpec(memory_space=pltpu.MemorySpace.SMEM),   # word_lens_bytes
            pl.BlockSpec(memory_space=pltpu.MemorySpace.VMEM),   # word_embeddings (bf16)
            pl.BlockSpec(memory_space=pltpu.MemorySpace.VMEM),   # fused weight (bf16)
        ],
        out_specs=pl.BlockSpec(memory_space=pltpu.MemorySpace.VMEM),
        compiler_params=pltpu.CompilerParams(vmem_limit_bytes=4 * 1024 * 1024),
        cost_estimate=pl.CostEstimate(flops=flops, transcendentals=0,
                                      bytes_accessed=bytes_accessed),
    )(lens_i32, x_bf16, w_fused.astype(jnp.bfloat16))


# ----------------------------- pure-JAX reference -----------------------------
def _ref(word_embeddings, w_v, w_o, word_lens_bytes, total_bytes):
    v = word_embeddings @ w_v
    out = v @ w_o
    return jnp.repeat(out, word_lens_bytes, axis=0, total_repeat_length=total_bytes)


# TODO(synk): tensor-parallel sharding (ColumnParallelLinear / RowParallelLinear
# splits) and quant_config weight loading have no standalone equivalent here;
# tp_size=1 dense weights (pre-fused, bf16) are used.

if __name__ == "__main__":
    root = jax.random.PRNGKey(0)
    k_x, k_v, k_o = jax.random.split(root, 3)

    word_embeddings = jax.random.normal(k_x, (N_WORDS, KV_HIDDEN), jnp.float32)
    w_v = jax.random.normal(k_v, (KV_HIDDEN, HIDDEN), jnp.float32) * 0.05
    w_o = jax.random.normal(k_o, (HIDDEN, Q_HIDDEN), jnp.float32) * 0.05
    # deterministic byte lengths (includes a zero-length word); sums to 32
    word_lens_bytes = jnp.array([3, 1, 4, 0, 5, 3, 8, 8], jnp.int32)

    # Weight fusion happens once, at "weight load" time, outside the hot path.
    w_fused = fuse_guide_weights(w_v, w_o)

    out = hat_guide_vector_add(word_embeddings, w_fused,
                               word_lens_bytes, TOTAL_BYTES)
    out = jax.block_until_ready(out)

    ref = _ref(word_embeddings, w_v, w_o, word_lens_bytes, TOTAL_BYTES)
    assert out.shape == (TOTAL_BYTES, Q_HIDDEN)
    # bf16 weights/activations + weight re-association -> loose-ish tolerance
    # vs. the pure-f32 torch-equivalent reference.
    max_err = float(jnp.max(jnp.abs(out - ref)))
    assert jnp.allclose(out, ref, rtol=3e-2, atol=3e-2), max_err
    print("KERNEL_OK")
</pallas_src>

<mosaic_0001>
module attributes {stable_mosaic.version = 11 : i64} {
  func.func @_guide_kernel(%arg0: memref<8xi32, #tpu.memory_space<smem>>, %arg1: memref<8x128xbf16, #tpu.memory_space<vmem>>, %arg2: memref<128x128xbf16, #tpu.memory_space<vmem>>, %arg3: memref<32x128xf32, #tpu.memory_space<vmem>>) attributes {dimension_semantics = [], scalar_prefetch = 0 : i64, scratch_operands = 0 : i64, tpu.core_type = #tpu.core_type<tc>} {
    %c0 = arith.constant 0 : index
    %c0_0 = arith.constant 0 : index
    %0 = vector.load %arg1[%c0, %c0_0] : memref<8x128xbf16, #tpu.memory_space<vmem>>, vector<8x128xbf16>
    %c0_1 = arith.constant 0 : index
    %c0_2 = arith.constant 0 : index
    %1 = vector.load %arg2[%c0_1, %c0_2] : memref<128x128xbf16, #tpu.memory_space<vmem>>, vector<128x128xbf16>
    %cst = arith.constant dense<0.000000e+00> : vector<8x128xf32>
    %2 = tpu.matmul %0, %1, %cst {dimension_numbers = #tpu.dot_dimension_numbers<[1], [0], [0], [1], [0, 0, 1, 1], [], []>} : vector<8x128xbf16>, vector<128x128xbf16>, vector<8x128xf32> -> vector<8x128xf32>
    %3 = tpu.iota {dimensions = array<i32: 0>} : vector<32x1xi32>
    %cst_3 = arith.constant 0.000000e+00 : f32
    %4 = vector.broadcast %cst_3 : f32 to vector<32x128xf32>
    %c0_4 = arith.constant 0 : index
    %5 = memref.load %arg0[%c0_4] : memref<8xi32, #tpu.memory_space<smem>>
    %c0_i32 = arith.constant 0 : i32
    %6 = arith.addi %c0_i32, %5 : i32
    %c0_i32_5 = arith.constant 0 : i32
    %7 = vector.broadcast %c0_i32_5 : i32 to vector<32x1xi32>
    %8 = arith.cmpi sge, %3, %7 : vector<32x1xi32>
    %9 = vector.broadcast %6 : i32 to vector<32x1xi32>
    %10 = arith.cmpi slt, %3, %9 : vector<32x1xi32>
    %11 = arith.andi %8, %10 : vector<32x1xi1>
    %12 = vector.extract_strided_slice %2 {offsets = [0, 0], sizes = [1, 128], strides = [1, 1]} : vector<8x128xf32> to vector<1x128xf32>
    %13 = vector.shape_cast %12 : vector<1x128xf32> to vector<128xf32>
    %14 = vector.shape_cast %13 : vector<128xf32> to vector<1x128xf32>
    %15 = vector.shape_cast %11 : vector<32x1xi1> to vector<32x1xi1>
    %16 = vector.broadcast %15 : vector<32x1xi1> to vector<32x128xi1>
    %17 = vector.shape_cast %14 : vector<1x128xf32> to vector<1x128xf32>
    %18 = vector.broadcast %17 : vector<1x128xf32> to vector<32x128xf32>
    %19 = arith.select %16, %18, %4 : vector<32x128xi1>, vector<32x128xf32>
    %c1 = arith.constant 1 : index
    %20 = memref.load %arg0[%c1] : memref<8xi32, #tpu.memory_space<smem>>
    %21 = arith.addi %6, %20 : i32
    %22 = vector.broadcast %6 : i32 to vector<32x1xi32>
    %23 = arith.cmpi sge, %3, %22 : vector<32x1xi32>
    %24 = vector.broadcast %21 : i32 to vector<32x1xi32>
    %25 = arith.cmpi slt, %3, %24 : vector<32x1xi32>
    %26 = arith.andi %23, %25 : vector<32x1xi1>
    %27 = vector.extract_strided_slice %2 {offsets = [1, 0], sizes = [1, 128], strides = [1, 1]} : vector<8x128xf32> to vector<1x128xf32>
    %28 = vector.shape_cast %27 : vector<1x128xf32> to vector<128xf32>
    %29 = vector.shape_cast %28 : vector<128xf32> to vector<1x128xf32>
    %30 = vector.shape_cast %26 : vector<32x1xi1> to vector<32x1xi1>
    %31 = vector.broadcast %30 : vector<32x1xi1> to vector<32x128xi1>
    %32 = vector.shape_cast %29 : vector<1x128xf32> to vector<1x128xf32>
    %33 = vector.broadcast %32 : vector<1x128xf32> to vector<32x128xf32>
    %34 = arith.select %31, %33, %19 : vector<32x128xi1>, vector<32x128xf32>
    %c2 = arith.constant 2 : index
    %35 = memref.load %arg0[%c2] : memref<8xi32, #tpu.memory_space<smem>>
    %36 = arith.addi %21, %35 : i32
    %37 = vector.broadcast %21 : i32 to vector<32x1xi32>
    %38 = arith.cmpi sge, %3, %37 : vector<32x1xi32>
    %39 = vector.broadcast %36 : i32 to vector<32x1xi32>
    %40 = arith.cmpi slt, %3, %39 : vector<32x1xi32>
    %41 = arith.andi %38, %40 : vector<32x1xi1>
    %42 = vector.extract_strided_slice %2 {offsets = [2, 0], sizes = [1, 128], strides = [1, 1]} : vector<8x128xf32> to vector<1x128xf32>
    %43 = vector.shape_cast %42 : vector<1x128xf32> to vector<128xf32>
    %44 = vector.shape_cast %43 : vector<128xf32> to vector<1x128xf32>
    %45 = vector.shape_cast %41 : vector<32x1xi1> to vector<32x1xi1>
    %46 = vector.broadcast %45 : vector<32x1xi1> to vector<32x128xi1>
    %47 = vector.shape_cast %44 : vector<1x128xf32> to vector<1x128xf32>
    %48 = vector.broadcast %47 : vector<1x128xf32> to vector<32x128xf32>
    %49 = arith.select %46, %48, %34 : vector<32x128xi1>, vector<32x128xf32>
    %c3 = arith.constant 3 : index
    %50 = memref.load %arg0[%c3] : memref<8xi32, #tpu.memory_space<smem>>
    %51 = arith.addi %36, %50 : i32
    %52 = vector.broadcast %36 : i32 to vector<32x1xi32>
    %53 = arith.cmpi sge, %3, %52 : vector<32x1xi32>
    %54 = vector.broadcast %51 : i32 to vector<32x1xi32>
    %55 = arith.cmpi slt, %3, %54 : vector<32x1xi32>
    %56 = arith.andi %53, %55 : vector<32x1xi1>
    %57 = vector.extract_strided_slice %2 {offsets = [3, 0], sizes = [1, 128], strides = [1, 1]} : vector<8x128xf32> to vector<1x128xf32>
    %58 = vector.shape_cast %57 : vector<1x128xf32> to vector<128xf32>
    %59 = vector.shape_cast %58 : vector<128xf32> to vector<1x128xf32>
    %60 = vector.shape_cast %56 : vector<32x1xi1> to vector<32x1xi1>
    %61 = vector.broadcast %60 : vector<32x1xi1> to vector<32x128xi1>
    %62 = vector.shape_cast %59 : vector<1x128xf32> to vector<1x128xf32>
    %63 = vector.broadcast %62 : vector<1x128xf32> to vector<32x128xf32>
    %64 = arith.select %61, %63, %49 : vector<32x128xi1>, vector<32x128xf32>
    %c4 = arith.constant 4 : index
    %65 = memref.load %arg0[%c4] : memref<8xi32, #tpu.memory_space<smem>>
    %66 = arith.addi %51, %65 : i32
    %67 = vector.broadcast %51 : i32 to vector<32x1xi32>
    %68 = arith.cmpi sge, %3, %67 : vector<32x1xi32>
    %69 = vector.broadcast %66 : i32 to vector<32x1xi32>
    %70 = arith.cmpi slt, %3, %69 : vector<32x1xi32>
    %71 = arith.andi %68, %70 : vector<32x1xi1>
    %72 = vector.extract_strided_slice %2 {offsets = [4, 0], sizes = [1, 128], strides = [1, 1]} : vector<8x128xf32> to vector<1x128xf32>
    %73 = vector.shape_cast %72 : vector<1x128xf32> to vector<128xf32>
    %74 = vector.shape_cast %73 : vector<128xf32> to vector<1x128xf32>
    %75 = vector.shape_cast %71 : vector<32x1xi1> to vector<32x1xi1>
    %76 = vector.broadcast %75 : vector<32x1xi1> to vector<32x128xi1>
    %77 = vector.shape_cast %74 : vector<1x128xf32> to vector<1x128xf32>
    %78 = vector.broadcast %77 : vector<1x128xf32> to vector<32x128xf32>
    %79 = arith.select %76, %78, %64 : vector<32x128xi1>, vector<32x128xf32>
    %c5 = arith.constant 5 : index
    %80 = memref.load %arg0[%c5] : memref<8xi32, #tpu.memory_space<smem>>
    %81 = arith.addi %66, %80 : i32
    %82 = vector.broadcast %66 : i32 to vector<32x1xi32>
    %83 = arith.cmpi sge, %3, %82 : vector<32x1xi32>
    %84 = vector.broadcast %81 : i32 to vector<32x1xi32>
    %85 = arith.cmpi slt, %3, %84 : vector<32x1xi32>
    %86 = arith.andi %83, %85 : vector<32x1xi1>
    %87 = vector.extract_strided_slice %2 {offsets = [5, 0], sizes = [1, 128], strides = [1, 1]} : vector<8x128xf32> to vector<1x128xf32>
    %88 = vector.shape_cast %87 : vector<1x128xf32> to vector<128xf32>
    %89 = vector.shape_cast %88 : vector<128xf32> to vector<1x128xf32>
    %90 = vector.shape_cast %86 : vector<32x1xi1> to vector<32x1xi1>
    %91 = vector.broadcast %90 : vector<32x1xi1> to vector<32x128xi1>
    %92 = vector.shape_cast %89 : vector<1x128xf32> to vector<1x128xf32>
    %93 = vector.broadcast %92 : vector<1x128xf32> to vector<32x128xf32>
    %94 = arith.select %91, %93, %79 : vector<32x128xi1>, vector<32x128xf32>
    %c6 = arith.constant 6 : index
    %95 = memref.load %arg0[%c6] : memref<8xi32, #tpu.memory_space<smem>>
    %96 = arith.addi %81, %95 : i32
    %97 = vector.broadcast %81 : i32 to vector<32x1xi32>
    %98 = arith.cmpi sge, %3, %97 : vector<32x1xi32>
    %99 = vector.broadcast %96 : i32 to vector<32x1xi32>
    %100 = arith.cmpi slt, %3, %99 : vector<32x1xi32>
    %101 = arith.andi %98, %100 : vector<32x1xi1>
    %102 = vector.extract_strided_slice %2 {offsets = [6, 0], sizes = [1, 128], strides = [1, 1]} : vector<8x128xf32> to vector<1x128xf32>
    %103 = vector.shape_cast %102 : vector<1x128xf32> to vector<128xf32>
    %104 = vector.shape_cast %103 : vector<128xf32> to vector<1x128xf32>
    %105 = vector.shape_cast %101 : vector<32x1xi1> to vector<32x1xi1>
    %106 = vector.broadcast %105 : vector<32x1xi1> to vector<32x128xi1>
    %107 = vector.shape_cast %104 : vector<1x128xf32> to vector<1x128xf32>
    %108 = vector.broadcast %107 : vector<1x128xf32> to vector<32x128xf32>
    %109 = arith.select %106, %108, %94 : vector<32x128xi1>, vector<32x128xf32>
    %c7 = arith.constant 7 : index
    %110 = memref.load %arg0[%c7] : memref<8xi32, #tpu.memory_space<smem>>
    %111 = arith.addi %96, %110 : i32
    %112 = vector.broadcast %96 : i32 to vector<32x1xi32>
    %113 = arith.cmpi sge, %3, %112 : vector<32x1xi32>
    %114 = vector.broadcast %111 : i32 to vector<32x1xi32>
    %115 = arith.cmpi slt, %3, %114 : vector<32x1xi32>
    %116 = arith.andi %113, %115 : vector<32x1xi1>
    %117 = vector.extract_strided_slice %2 {offsets = [7, 0], sizes = [1, 128], strides = [1, 1]} : vector<8x128xf32> to vector<1x128xf32>
    %118 = vector.shape_cast %117 : vector<1x128xf32> to vector<128xf32>
    %119 = vector.shape_cast %118 : vector<128xf32> to vector<1x128xf32>
    %120 = vector.shape_cast %116 : vector<32x1xi1> to vector<32x1xi1>
    %121 = vector.broadcast %120 : vector<32x1xi1> to vector<32x128xi1>
    %122 = vector.shape_cast %119 : vector<1x128xf32> to vector<1x128xf32>
    %123 = vector.broadcast %122 : vector<1x128xf32> to vector<32x128xf32>
    %124 = arith.select %121, %123, %109 : vector<32x128xi1>, vector<32x128xf32>
    %c0_6 = arith.constant 0 : index
    %c0_7 = arith.constant 0 : index
    %125 = vector.load %arg3[%c0_6, %c0_7] : memref<32x128xf32, #tpu.memory_space<vmem>>, vector<32x128xf32>
    tpu.vector_store %arg3[%c0_6, %c0_7], %124 {strides = array<i32>} : memref<32x128xf32, #tpu.memory_space<vmem>>, vector<32x128xf32>,
    return
  }
}

</mosaic_0001>

<bundles_post_ra>
// kernel: tpu_custom_call.1
= control target key start
LH: loop header
LB: loop body
LE: loop exit
PB: predicated region body
PF: predicated region fallthrough
CT: control target
= control target key end

     0   :  { %8 = vsyncpa [#allocation5], 0  ;;  %s1066_s0 = inlined_call_operand.hbm [shape: s32[8], index: 0, kind: input, shape index: {}]   ;;  %s1067_s1 = inlined_call_operand.hbm [shape: bf16[8,128], index: 1, kind: input, shape index: {}]   ;;  %s1068_s2 = inlined_call_operand.hbm [shape: bf16[128,128], index: 2, kind: input, shape index: {}]   ;;  %s1069_s3 = inlined_call_operand.hbm [shape: f32[32,128], index: 3, kind: output, shape index: {}]  }
   0x1   :  { %9 = vsyncpa [#allocation3], 0 }
   0x2   :  { %10 = vsyncpa [#allocation8], 0 }
   0x3   :  { %11 = vsyncpa [#allocation4], 0  ;;  %s571_s12 = smov [#allocation2]   ;;  %s572_s15 = smov [#allocation6]  }
   0x4   :  { %19 = dma.hbm_to_smem %s1066_s0, 16, %s571_s12, [#allocation5]  }
   0x5   :  { %s26_s16 = sshll.u32 %s572_s15, 4  ;;  %s573_s17 = smov [#allocation7]   ;;  %s27_s16 = int_to_ptr.vmem [resolvable:$true] %s26_s16 }
   0x6   :  { %s35_s18 = sshll.u32 %s573_s17, 4  ;;  %s511_s19 = scalar_lea.vmem %s27_s16, 64  ;;  %s36_s18 = int_to_ptr.vmem [resolvable:$true] %s35_s18 }
   0x7   :  { %p512_p0 = scmp.ne.s32.totalorder %s27_s16, %s511_s19  ;;  %p516_p1 = scmp.lt.s32.totalorder %s27_s16, %s27_s16 }
   0x8   :  { %p517_p2 = scmp.lt.s32.totalorder %s511_s19, %s511_s19 }
   0xa   :  { %p518_p3 = por %p517_p2, %p516_p1 }
   0xc   :  { %p519_p4 = pnand %p518_p3, %p512_p0 }
   0xe   :  { %522 = shalt.err (!%p519_p4)
}
   0xf   :  { %29 = dma.hbm_to_vmem [thread:$0]  %s1067_s1, 64, %s27_s16, [#allocation3]  }
  0x10   :  { %s531_s22 = scalar_lea.vmem %s36_s18, 1024  ;;  %p536_p6 = scmp.lt.s32.totalorder %s36_s18, %s36_s18 }
  0x11   :  { %p532_p5 = scmp.ne.s32.totalorder %s36_s18, %s531_s22  ;;  %p537_p7 = scmp.lt.s32.totalorder %s531_s22, %s531_s22 }
  0x13   :  { %p538_p8 = por %p537_p7, %p536_p6 }
  0x15   :  { %p539_p9 = pnand %p538_p8, %p532_p5 }
  0x17   :  { %542 = shalt.err (!%p539_p9)
}
  0x18   :  { %s574_s0 = smov 64   ;;  %s575_s23 = smov 4  }
  0x19   :  { %41 = dma.hbm_to_vmem [thread:$0]  %s1068_s2, 1024, %s36_s18, [#allocation8], %s574_s0, %s574_s0, %s575_s23  }
  0x1a   :  { %563 = dma.done.wait [#allocation5], 16  }
  0x1b   :  { %564 = vsyncadd [#allocation5], 4294967280 }
  0x1c   :  { %565 = dma.done.wait [#allocation3], 64  }
  0x1d   :  { %566 = vsyncadd [#allocation3], 4294967232 }
  0x1e   :  { %567 = dma.done.wait [#allocation8], 1024  }
  0x1f   :  { %568 = vsyncadd [#allocation8], 4294966272 }
  0x20   :  { %51 = sfence }
  0x21   :  { %v487_v0 = vld [vmem:[#allocation7 + $0x38] sm:$0xff]   ;;  %v576_v1 = vmov 0.0   ;;  %v488_v2 = vld [vmem:[#allocation7 + $0x30] sm:$0xff]   ;;  %vm577_vm0 = vmmov 0   ;;  %v489_v3 = vld [vmem:[#allocation7 + $0x28] sm:$0xff]   ;;  %s163_s1 = sld [smem:[#allocation2]]  ;;  %v158_v10 = vlaneseq }
  0x22   :  { %457 = vmatprep.subr.bf16.mxu0 %v576_v1  ;;  %473 = vmatprep.mubr.msk.bf16.mxu0 %vm577_vm0, %v576_v1  ;;  %v490_v4 = vld [vmem:[#allocation7 + $0x20] sm:$0xff]   ;;  %v491_v5 = vld [vmem:[#allocation7 + $0x18] sm:$0xff]   ;;  %v492_v6 = vld [vmem:[#allocation7 + $0x10] sm:$0xff]   ;;  %s441_s2 = sld [smem:[#allocation2 + $0x1]]  ;;  %v1084_v35 = vmov 0  ;;  %v1088_v36 = vmov 0 }
  0x23   :  { %458 = vmatpush3.bf16.msra.mxu0 %v487_v0  ;;  %v493_v7 = vld [vmem:[#allocation7 + $0x8] sm:$0xff]   ;;  %v494_v8 = vld [vmem:[#allocation7] sm:$0xff]   ;;  %v53_v9 = vld [vmem:[#allocation6] sm:$0xf]  ;;  %s442_s26 = sld [smem:[#allocation2 + $0x2]]  ;;  %v610_v11 = vshrl.u32 %v158_v10, 7 }
  0x24   :  { %459 = vmatprep.subr.bf16.mxu0 %v576_v1  ;;  %s443_s27 = sld [smem:[#allocation2 + $0x3]]  ;;  %v1092_v37 = vmov 0  ;;  %v1096_v38 = vmov 0  ;;  %v1100_v39 = vmov 0  ;;  %v1104_v40 = vmov 0  ;;  %s578_s12 = smov [#allocation9]  }
  0x25   :  { %s444_s29 = sld [smem:[#allocation2 + $0x4]]  ;;  %v613_v12 = vadd.s32 8, %v610_v11  ;;  %v616_v13 = vadd.s32 16, %v610_v11  ;;  %v619_v14 = vadd.s32 24, %v610_v11  ;;  %v187_v16 = vsub.s32 0, %v610_v11  ;;  %s419_s13 = sshll.u32 %s578_s12, 4  ;;  %s420_s13 = int_to_ptr.vmem [resolvable:$true] %s419_s13 }
  0x26   :  { %s445_s4 = sld [smem:[#allocation2 + $0x5]]  ;;  %v218_v17 = vsub.s32 1, %v610_v11  ;;  %v249_v18 = vsub.s32 2, %v610_v11  ;;  %v280_v19 = vsub.s32 3, %v610_v11  ;;  %v311_v20 = vsub.s32 4, %v610_v11  ;;  %s543_s14 = scalar_lea.vmem %s420_s13, 512 }
  0x27   :  { %460 = vmatpush3.bf16.msra.mxu0 %v488_v2  ;;  %v621_v15 = vstv %s163_s1  ;;  %s623_s6 = sld [smem:[#allocation2 + $0x6]]  ;;  %v342_v22 = vsub.s32 5, %v610_v11  ;;  %v373_v23 = vsub.s32 6, %v610_v11  ;;  %v404_v24 = vsub.s32 7, %v610_v11  ;;  %p544_p10 = scmp.ne.s32.totalorder %s420_s13, %s543_s14 }
  0x28   :  { %461 = vmatprep.subr.bf16.mxu0 %v576_v1  ;;  %s194_s28 = sadd.s32 %s441_s2, %s163_s1  ;;  %vm195_vm1 = vcmp.ge.s32.totalorder %v610_v11, %v621_v15  ;;  %vm196_vm2 = vcmp.ge.s32.totalorder %v613_v12, %v621_v15  ;;  %vm197_vm3 = vcmp.ge.s32.totalorder %v616_v13, %v621_v15  ;;  %s643_s8 = sld [smem:[#allocation2 + $0x7]]  ;;  %v1108_v41 = vmov 0 }
  0x29   :  { %s225_s30 = sadd.s32 %s442_s26, %s194_s28  ;;  %v199_v21 = vstv %s194_s28  ;;  %v1112_v42 = vmov 0  ;;  %v1116_v43 = vmov 0  ;;  %v1120_v44 = vmov 0  ;;  %p548_p11 = scmp.lt.s32.totalorder %s420_s13, %s420_s13 }
  0x2a   :  { %s256_s5 = sadd.s32 %s443_s27, %s225_s30  ;;  %v230_v25 = vstv %s225_s30  ;;  %vm200_vm5 = vcmp.lt.s32.totalorder %v610_v11, %v199_v21  ;;  %vm201_vm6 = vcmp.lt.s32.totalorder %v613_v12, %v199_v21  ;;  %vm202_vm7 = vcmp.lt.s32.totalorder %v616_v13, %v199_v21  ;;  %p549_p12 = scmp.lt.s32.totalorder %s543_s14, %s543_s14 }
  0x2b   :  { %462 = vmatpush3.bf16.msra.mxu0 %v489_v3  ;;  %s630_s7 = sadd.s32 %s444_s29, %s256_s5  ;;  %v261_v26 = vstv %s256_s5  ;;  %vm231_vm13 = vcmp.lt.s32.totalorder %v610_v11, %v230_v25  ;;  %vm232_vm14 = vcmp.lt.s32.totalorder %v613_v12, %v230_v25  ;;  %vm686_vm0 = vmand %vm195_vm1, %vm200_vm5  ;;  %vm1076_vm1 = vcmp.lt.s32.totalorder %v619_v14, %v199_v21 }
  0x2c   :  { %463 = vmatprep.subr.bf16.mxu0 %v576_v1  ;;  %s318_s9 = sadd.s32 %s445_s4, %s630_s7  ;;  %v292_v27 = vstv %s630_s7  ;;  %vm695_vm9 = vmand %vm196_vm2, %vm201_vm6  ;;  %vm1077_vm5 = vcmp.ge.s32.totalorder %v619_v14, %v621_v15  ;;  %vm1086_vm11 = vcmp.lt.s32.totalorder %v616_v13, %v230_v25  ;;  %vm1103_vm12 = vcmp.ge.s32.totalorder %v616_v13, %v230_v25  ;;  %p550_p13 = por %p549_p12, %p548_p11 }
  0x2d   :  { %s662_s10 = sadd.s32 %s623_s6, %s318_s9  ;;  %v671_v28 = vstv %s318_s9  ;;  %vm704_vm10 = vmand %vm197_vm3, %vm202_vm7  ;;  %vm1080_vm7 = vcmp.ge.s32.totalorder %v610_v11, %v199_v21  ;;  %vm1087_vm3 = vcmp.ge.s32.totalorder %v616_v13, %v199_v21  ;;  %v1124_v45 = vmov 0 }
  0x2e   :  { %v679_v29 = vstv %s662_s10  ;;  %vm713_vm4 = vmand %vm1077_vm5, %vm1076_vm1  ;;  %s380_s11 = sadd.s32 %s643_s8, %s662_s10  ;;  %vm1083_vm1 = vcmp.ge.s32.totalorder %v613_v12, %v199_v21  ;;  %v1128_v47 = vmov 0  ;;  %v1132_v48 = vmov 0  ;;  %p551_p0 = pnand %p550_p13, %p544_p10 }
  0x2f   :  { %464 = vmatpush3.bf16.msra.mxu0 %v490_v4  ;;  %vm727_vm8 = vmand %vm1080_vm7, %vm231_vm13  ;;  %vm1090_vm13 = vcmp.lt.s32.totalorder %v619_v14, %v230_v25  ;;  %vm1091_vm7 = vcmp.ge.s32.totalorder %v619_v14, %v199_v21  ;;  %v837_v46 = vstv %s380_s11  ;;  %v1148_v63 = vmov 0 }
  0x30   :  { %465 = vmatprep.subr.bf16.mxu0 %v576_v1  ;;  %vm735_vm5 = vmand %vm1083_vm1, %vm232_vm14  ;;  %vm1098_vm1 = vcmp.lt.s32.totalorder %v613_v12, %v261_v26  ;;  %vm1099_vm14 = vcmp.ge.s32.totalorder %v613_v12, %v230_v25 }
  0x31   :  { %v1085_v35 = vsel %vm735_vm5, 4294967295, %v1084_v35  ;;  %vm743_vm6 = vmand %vm1087_vm3, %vm1086_vm11  ;;  %vm1102_vm3 = vcmp.lt.s32.totalorder %v616_v13, %v261_v26 }
  0x32   :  { %v1089_v36 = vsel %vm743_vm6, 4294967295, %v1088_v36  ;;  %vm751_vm2 = vmand %vm1091_vm7, %vm1090_vm13  ;;  %vm1094_vm13 = vcmp.lt.s32.totalorder %v610_v11, %v261_v26  ;;  %vm1095_vm7 = vcmp.ge.s32.totalorder %v610_v11, %v230_v25  ;;  %vm1150_vm6 = vcmp.lt.s32.totalorder %v610_v11, %v621_v15 }
  0x33   :  { %466 = vmatpush3.bf16.msra.mxu0 %v491_v5  ;;  %v1093_v37 = vsel %vm751_vm2, 4294967295, %v1092_v37  ;;  %vm769_vm2 = vmand %vm1095_vm7, %vm1094_vm13  ;;  %vm1106_vm13 = vcmp.lt.s32.totalorder %v619_v14, %v261_v26  ;;  %vm1107_vm7 = vcmp.ge.s32.totalorder %v619_v14, %v230_v25 }
  0x34   :  { %467 = vmatprep.subr.bf16.mxu0 %v576_v1  ;;  %v1097_v38 = vsel %vm769_vm2, 4294967295, %v1096_v38  ;;  %vm777_vm15 = vmand %vm1099_vm14, %vm1098_vm1  ;;  %vm1118_vm14 = vcmp.lt.s32.totalorder %v616_v13, %v292_v27 }
  0x35   :  { %v1101_v39 = vsel %vm777_vm15, 4294967295, %v1100_v39  ;;  %vm785_vm11 = vmand %vm1103_vm12, %vm1102_vm3  ;;  %vm1110_vm12 = vcmp.lt.s32.totalorder %v610_v11, %v292_v27  ;;  %vm1111_vm3 = vcmp.ge.s32.totalorder %v610_v11, %v261_v26  ;;  %vm1119_vm15 = vcmp.ge.s32.totalorder %v616_v13, %v261_v26 }
  0x36   :  { %v1105_v40 = vsel %vm785_vm11, 4294967295, %v1104_v40  ;;  %vm793_vm2 = vmand %vm1107_vm7, %vm1106_vm13  ;;  %vm1114_vm13 = vcmp.lt.s32.totalorder %v613_v12, %v292_v27  ;;  %vm1115_vm7 = vcmp.ge.s32.totalorder %v613_v12, %v261_v26 }
  0x37   :  { %468 = vmatpush3.bf16.msra.mxu0 %v492_v6  ;;  %v1109_v41 = vsel %vm793_vm2, 4294967295, %v1108_v41  ;;  %vm806_vm11 = vmand %vm1111_vm3, %vm1110_vm12  ;;  %vm1122_vm12 = vcmp.lt.s32.totalorder %v619_v14, %v292_v27  ;;  %vm1123_vm3 = vcmp.ge.s32.totalorder %v619_v14, %v261_v26 }
  0x38   :  { %469 = vmatprep.subr.bf16.mxu0 %v576_v1  ;;  %v1113_v42 = vsel %vm806_vm11, 4294967295, %v1112_v42  ;;  %vm814_vm2 = vmand %vm1115_vm7, %vm1114_vm13  ;;  %vm322_vm13 = vcmp.ge.s32.totalorder %v619_v14, %v292_v27  ;;  %vm327_vm7 = vcmp.lt.s32.totalorder %v619_v14, %v671_v28 }
  0x39   :  { %v1117_v43 = vsel %vm814_vm2, 4294967295, %v1116_v43  ;;  %vm822_vm1 = vmand %vm1119_vm15, %vm1118_vm14  ;;  %vm1126_vm15 = vcmp.lt.s32.totalorder %v610_v11, %v671_v28  ;;  %vm1127_vm14 = vcmp.ge.s32.totalorder %v610_v11, %v292_v27 }
  0x3a   :  { %v1121_v44 = vsel %vm822_vm1, 4294967295, %v1120_v44  ;;  %vm830_vm11 = vmand %vm1123_vm3, %vm1122_vm12  ;;  %vm1130_vm12 = vcmp.lt.s32.totalorder %v613_v12, %v671_v28  ;;  %vm1131_vm3 = vcmp.ge.s32.totalorder %v613_v12, %v292_v27 }
  0x3b   :  { %470 = vmatpush3.bf16.msra.mxu0 %v493_v7  ;;  %v1125_v45 = vsel %vm830_vm11, 4294967295, %v1124_v45  ;;  %vm844_vm1 = vmand %vm1127_vm14, %vm1126_vm15  ;;  %vm355_vm14 = vcmp.lt.s32.totalorder %v610_v11, %v679_v29  ;;  %vm357_vm15 = vcmp.lt.s32.totalorder %v616_v13, %v679_v29 }
  0x3c   :  { %471 = vmatprep.subr.bf16.mxu0 %v576_v1  ;;  %v1129_v47 = vsel %vm844_vm1, 4294967295, %v1128_v47  ;;  %vm853_vm11 = vmand %vm1131_vm3, %vm1130_vm12  ;;  %vm1134_vm1 = vcmp.lt.s32.totalorder %v616_v13, %v671_v28  ;;  %vm1135_vm12 = vcmp.ge.s32.totalorder %v616_v13, %v292_v27 }
  0x3d   :  { %v1133_v48 = vsel %vm853_vm11, 4294967295, %v1132_v48  ;;  %vm870_vm3 = vmand %vm1135_vm12, %vm1134_vm1  ;;  %vm1140_vm11 = vcmp.ge.s32.totalorder %v610_v11, %v671_v28  ;;  %vm1151_vm12 = vcmp.lt.s32.totalorder %v613_v12, %v621_v15  ;;  %vm1152_vm1 = vcmp.lt.s32.totalorder %v616_v13, %v621_v15 }
  0x3e   :  { %vm882_vm5 = vmand %vm322_vm13, %vm327_vm7  ;;  %vm1153_vm7 = vcmp.lt.s32.totalorder %v619_v14, %v621_v15 }
  0x3f   :  { %472 = vmatpush3.bf16.msra.mxu0 %v494_v8  ;;  %vm897_vm13 = vmand %vm1140_vm11, %vm355_vm14  ;;  %vm1143_vm11 = vcmp.lt.s32.totalorder %v613_v12, %v679_v29  ;;  %vm1144_vm14 = vcmp.ge.s32.totalorder %v613_v12, %v671_v28 }
  0x40   :  { %vm923_vm2 = vmand %vm1144_vm14, %vm1143_vm11  ;;  %vm1147_vm11 = vcmp.ge.s32.totalorder %v616_v13, %v671_v28 }
  0x41   :  { %vm941_vm14 = vmand %vm1147_vm11, %vm357_vm15  ;;  %vm1154_vm15 = vcmp.lt.s32.totalorder %v619_v14, %v679_v29  ;;  %vm1155_vm11 = vcmp.ge.s32.totalorder %v619_v14, %v671_v28 }
  0x42   :  { %474 = vmatmul.mubr.bf16.vlgmr.msra.gmra.mxu0 %v53_v9  ;;  %v1149_v63 = vsel %vm941_vm14, 4294967295, %v1148_v63  ;;  %vm963_vm14 = vmand %vm1155_vm11, %vm1154_vm15  ;;  %vm1170_vm11 = vnez %v1101_v39 }
 0x102   :  { %v152_v51 = vpop.f32.mrf.mxu0 }
 0x103   :  { %v188_v53 = vrot.slane %v152_v51, %v187_v16  ;;  %v219_v54 = vrot.slane %v152_v51, %v218_v17  ;;  %v250_v55 = vrot.slane %v152_v51, %v249_v18  ;;  %v281_v56 = vrot.slane %v152_v51, %v280_v19 }
 0x104   :  { %v312_v58 = vrot.slane %v152_v51, %v311_v20  ;;  %v343_v59 = vrot.slane %v152_v51, %v342_v22  ;;  %v374_v60 = vrot.slane %v152_v51, %v373_v23  ;;  %v405_v61 = vrot.slane %v152_v51, %v404_v24  ;;  %v475_v62 = vpop.f32.mrf.mxu0 }
 0x105   :  { %v189_v0 = vsel %vm1150_vm6, %v188_v53, 0.0  ;;  %v190_v1 = vsel %vm1151_vm12, %v188_v53, 0.0  ;;  %v191_v2 = vsel %vm1152_vm1, %v188_v53, 0.0  ;;  %v192_v3 = vsel %vm1153_vm7, %v188_v53, 0.0 }
 0x106   :  { %v155_v5 = vpop.f32.mrf.mxu0  ;;  %v220_v6 = vsel %vm686_vm0, %v219_v54, %v189_v0  ;;  %v221_v7 = vsel %vm695_vm9, %v219_v54, %v190_v1  ;;  %v222_v8 = vsel %vm704_vm10, %v219_v54, %v191_v2  ;;  %v223_v9 = vsel %vm713_vm4, %v219_v54, %v192_v3 }
 0x107   :  { %vm1158_vm6 = vcmp.lt.s32.totalorder %v610_v11, %v837_v46  ;;  %vm1159_vm1 = vcmp.ge.s32.totalorder %v610_v11, %v679_v29  ;;  %v251_v15 = vsel %vm727_vm8, %v250_v55, %v220_v6  ;;  %vm1162_vm9 = vnez %v1085_v35 }
 0x108   :  { %vm981_vm12 = vmand %vm1159_vm1, %vm1158_vm6  ;;  %v252_v16 = vsel %vm1162_vm9, %v250_v55, %v221_v7  ;;  %vm1163_vm10 = vnez %v1089_v36  ;;  %vm1164_vm4 = vnez %v1093_v37  ;;  %vm1165_vm0 = vcmp.lt.s32.totalorder %v613_v12, %v837_v46  ;;  %v476_v19 = vpop.f32.mrf.mxu0 }
 0x109   :  { %v253_v17 = vsel %vm1163_vm10, %v250_v55, %v222_v8  ;;  %v254_v18 = vsel %vm1164_vm4, %v250_v55, %v223_v9  ;;  %vm1166_vm7 = vcmp.ge.s32.totalorder %v613_v12, %v679_v29  ;;  %vm1169_vm8 = vnez %v1097_v38 }
 0x10a   :  { %vm999_vm15 = vmand %vm1166_vm7, %vm1165_vm0  ;;  %v282_v20 = vsel %vm1169_vm8, %v281_v56, %v251_v15  ;;  %v283_v21 = vsel %vm1170_vm11, %v281_v56, %v252_v16  ;;  %vm1171_vm6 = vnez %v1105_v40  ;;  %vm1172_vm1 = vnez %v1109_v41 }
 0x10b   :  { %v284_v22 = vsel %vm1171_vm6, %v281_v56, %v253_v17  ;;  %v285_v23 = vsel %vm1172_vm1, %v281_v56, %v254_v18  ;;  %vm1173_vm9 = vcmp.lt.s32.totalorder %v616_v13, %v837_v46  ;;  %vm1174_vm10 = vcmp.ge.s32.totalorder %v616_v13, %v679_v29 }
 0x10c   :  { %vm1017_vm4 = vmand %vm1174_vm10, %vm1173_vm9  ;;  %vm1177_vm0 = vnez %v1113_v42  ;;  %vm1178_vm7 = vnez %v1117_v43  ;;  %vm1179_vm8 = vnez %v1121_v44  ;;  %vm1180_vm11 = vnez %v1125_v45 }
 0x10d   :  { %v313_v24 = vsel %vm1177_vm0, %v312_v58, %v282_v20  ;;  %v314_v25 = vsel %vm1178_vm7, %v312_v58, %v283_v21  ;;  %v315_v26 = vsel %vm1179_vm8, %v312_v58, %v284_v22  ;;  %v316_v27 = vsel %vm1180_vm11, %v312_v58, %v285_v23 }
 0x10e   :  { %vm1181_vm6 = vcmp.lt.s32.totalorder %v619_v14, %v837_v46  ;;  %vm1182_vm1 = vcmp.ge.s32.totalorder %v619_v14, %v679_v29  ;;  %vm1185_vm10 = vnez %v1129_v47  ;;  %vm1186_vm0 = vnez %v1133_v48 }
 0x10f   :  { %vm1035_vm9 = vmand %vm1182_vm1, %vm1181_vm6  ;;  %v344_v28 = vsel %vm1185_vm10, %v343_v59, %v313_v24  ;;  %v345_v30 = vsel %vm1186_vm0, %v343_v59, %v314_v25  ;;  %v346_v31 = vsel %vm870_vm3, %v343_v59, %v315_v26  ;;  %v347_v32 = vsel %vm882_vm5, %v343_v59, %v316_v27 }
 0x110   :  { %v375_v33 = vsel %vm897_vm13, %v374_v60, %v344_v28  ;;  %v376_v14 = vsel %vm923_vm2, %v374_v60, %v345_v30  ;;  %vm1187_vm7 = vnez %v1149_v63  ;;  %v378_v34 = vsel %vm963_vm14, %v374_v60, %v347_v32 }
 0x111   :  { %v377_v29 = vsel %vm1187_vm7, %v374_v60, %v346_v31  ;;  %v406_v35 = vsel %vm981_vm12, %v405_v61, %v375_v33  ;;  %v407_v36 = vsel %vm999_vm15, %v405_v61, %v376_v14  ;;  %v409_v38 = vsel %vm1035_vm9, %v405_v61, %v378_v34 }
 0x112   :  { %v408_v37 = vsel %vm1017_vm4, %v405_v61, %v377_v29  ;;  %410 = vst [vmem:[#allocation9] sm:$0xff] %v406_v35  ;;  %411 = vst [vmem:[#allocation9 + $0x8] sm:$0xff] %v407_v36 }
 0x113   :  { %412 = vst [vmem:[#allocation9 + $0x10] sm:$0xff] %v408_v37  ;;  %413 = vst [vmem:[#allocation9 + $0x18] sm:$0xff] %v409_v38 }
 0x114   :  { %554 = shalt.err (!%p551_p0)
}
 0x115   :  { %s579_s15 = smov 128   ;;  %s580_s16 = smov 8  }
 0x116   :  { %425 = dma.vmem_to_hbm [thread:$0]  %s420_s13, 512, %s1069_s3, [#allocation4], %s579_s15, %s579_s15, %s580_s16  }
 0x117   :  { %569 = dma.done.wait [#allocation4], 512  }
 0x118   :  { %570 = vsyncadd [#allocation4], 4294966784 }
 0x119   :  { %429 = vsyncpa [#allocation3], 1 }
 0x11a   :  { %430 = vsyncpa [#allocation8], 1 }
 0x11b   :  { %431 = vsyncpa [#allocation4], 1 }
 0x11c   :  { %432 = vsyncpa [#allocation5], 1 }

</bundles_post_ra>
